<compile_context>
chip_gen: v7x
topology: tpu7x:2x2x1
jax: 0.10.0
libtpu: 0.0.40
codegen_flags: <defaults>
</compile_context>

<pallas_src>
import jax
import jax.numpy as jnp
from jax.experimental import pallas as pl
from jax.experimental.pallas import tpu as pltpu


def _ceil_to(a, m):
    return (a + m - 1) // m * m


def _pick_v_tile(v_out, L, n_batch, target_lanes=2048):
    """V-extent TV of one output tile.

    TV must divide V_out and TV*L must be a multiple of 128 (lane-dense,
    unmasked stores); otherwise fall back to a single full-extent tile per
    batch (a block equal to the full array extent is always legal).  Prefer
    >= 2 tiles per batch when the batch dimension alone cannot feed two
    TensorCores (v7x).
    """
    cands = [tv for tv in range(1, v_out + 1)
             if v_out % tv == 0 and (tv * L) % 128 == 0]
    if not cands:
        return v_out
    pool = [tv for tv in cands if tv * L <= target_lanes] or [min(cands)]
    if n_batch < 2:
        split = [tv for tv in pool if v_out // tv >= 2]
        if split:
            pool = split
    return max(pool)


def _make_kernel(kt, L, TVL, n_vt, act):
    def kernel(x_ref, w_ref, b_ref, o_ref):
        # x_ref: (1, c_in, V*L)        w_ref: (n_groups, c_out, kt*c_in)
        # b_ref: (n_groups, c_out, 1)  o_ref: (1, c_out, TVL)
        if n_vt == 1:
            base = 0                                   # fully static slices
        else:
            base = pl.program_id(1) * TVL
            if TVL % 128 == 0:
                base = pl.multiple_of(base, 128)       # lane-aligned tile base

        # Stack the kt conv taps along K: tap dk is a shift of dk*L lanes of
        # the resident x slab.  One (c_out, kt*c_in) @ (kt*c_in, TVL) MXU dot
        # per group instead of kt shallow dots + VPU adds.
        taps = [x_ref[0, :, pl.ds(base + dk * L, TVL)] for dk in range(kt)]
        xs = taps[0] if kt == 1 else jnp.concatenate(taps, axis=0)

        def gconv(g):                                  # -> (c_out, TVL), f32
            acc = jnp.dot(w_ref[g], xs, preferred_element_type=jnp.float32)
            return acc + b_ref[g]                      # (c_out, 1) broadcast

        if act == "GLU":
            out = gconv(0) * jax.nn.sigmoid(gconv(1))
        elif act == "sigmoid":
            out = jax.nn.sigmoid(gconv(0))
        else:                                          # relu (default)
            out = jnp.maximum(gconv(0), 0.0)
        o_ref[0] = out.astype(o_ref.dtype)

    return kernel


def _fold_params(params, kt, c_in, c_out, act, compute_dtype):
    """Fold Align (1x1 conv / zero-pad / identity residual) into the dk=kt-1
    columns of the value weight and emit weights in the flipped, tap-fused
    layout: w[g] is (c_out, kt*c_in) with columns ordered dk-major then ci."""
    w_p = params["w_p"].astype(jnp.float32)            # (kt, c_in, c_out)
    b_p = params["b_p"].astype(jnp.float32).reshape(c_out, 1)
    if c_in > c_out:                                   # Align = 1x1 conv
        w_p = w_p.at[kt - 1].add(params["w_align"].astype(jnp.float32))
        b_p = b_p + params["b_align"].astype(jnp.float32).reshape(c_out, 1)
    else:                                              # zero-pad / identity
        w_p = w_p.at[kt - 1].add(jnp.eye(c_in, c_out, dtype=jnp.float32))

    def flip(w):                                       # (kt,ci,co)->(co,kt*ci)
        return jnp.transpose(w, (2, 0, 1)).reshape(w.shape[-1], kt * c_in)

    ws, bs = [flip(w_p)], [b_p]
    if act == "GLU":                                   # gate: no residual fold
        ws.append(flip(params["w_g"].astype(jnp.float32)))
        bs.append(params["b_g"].astype(jnp.float32).reshape(c_out, 1))
    w = jnp.stack(ws, axis=0).astype(compute_dtype)    # (n_groups,c_out,kt*ci)
    b = jnp.stack(bs, axis=0)                          # (n_groups,c_out,1) f32
    return w, b


def _vmem_estimate(c_in, c_out, V, L, TVL, kt, n_groups, isz, osz):
    """Rough padded VMEM footprint (double-buffered pipeline + temporaries)."""
    VL_p = _ceil_to(V * L, 128)
    TVL_p = _ceil_to(TVL, 128)
    x_slab = _ceil_to(c_in, 8) * VL_p * isz
    out_tile = _ceil_to(c_out, 8) * TVL_p * osz
    w_b = n_groups * _ceil_to(c_out, 8) * _ceil_to(kt * c_in, 128) * isz
    b_b = n_groups * _ceil_to(c_out, 8) * 128 * 4
    xs_tmp = _ceil_to(kt * c_in, 8) * TVL_p * isz
    acc = n_groups * _ceil_to(c_out, 8) * TVL_p * 4
    return 2 * (x_slab + out_tile + w_b + b_b) + xs_tmp + acc


def temporal_conv_layer(x, params, kt, c_in, c_out, act, *,
                        compute_dtype=jnp.bfloat16, out_dtype=None):
    """x: (N, C_in, L, V)  ->  (N, C_out, V-kt+1, L)  (PyTorch output layout)."""
    N, C, L, V = x.shape
    assert C == c_in
    V_out = V - kt + 1
    assert V_out >= 1
    M_out = V_out * L
    n_groups = 2 if act == "GLU" else 1
    out_dtype = jnp.dtype(x.dtype if out_dtype is None else out_dtype)

    w, b = _fold_params(params, kt, c_in, c_out, act, compute_dtype)

    # (N,C,L,V) -> (N,C,V,L) -> (N,C,V*L): the conv (V) axis becomes the major
    # part of the flattened lane axis, so a conv tap dk is a shift of dk*L
    # lanes.  This swap is the only wrapper-side layout op; the output needs
    # no transpose at all (pure reshape below).
    # TODO(synk): drop the swap if the surrounding model already carries
    # activations in (N, C, V, L) order.
    x_flat = jnp.swapaxes(x.astype(compute_dtype), -1, -2).reshape(
        N, c_in, V * L)

    TV = _pick_v_tile(V_out, L, N)
    TVL = TV * L
    n_vt = V_out // TV
    grid = (N, n_vt)

    in_specs = [
        pl.BlockSpec((1, c_in, V * L), lambda n, j: (n, 0, 0)),   # x slab
        pl.BlockSpec((n_groups, c_out, kt * c_in), lambda n, j: (0, 0, 0)),
        pl.BlockSpec((n_groups, c_out, 1), lambda n, j: (0, 0, 0)),
    ]
    out_specs = pl.BlockSpec((1, c_out, TVL), lambda n, j: (n, 0, j))

    isz = jnp.dtype(compute_dtype).itemsize
    osz = out_dtype.itemsize
    cost = pl.CostEstimate(
        flops=int(2 * N * M_out * kt * c_in * n_groups * c_out),
        transcendentals=int(N * M_out * c_out) if act in ("GLU", "sigmoid") else 0,
        bytes_accessed=int(N * c_in * V * L * isz
                           + n_groups * c_out * kt * c_in * isz
                           + n_groups * c_out * 4
                           + N * M_out * c_out * osz),
    )

    compiler_kwargs = dict(
        dimension_semantics=("parallel", "parallel"),
        allow_input_fusion=[True, False, False],
    )
    vmem_est = _vmem_estimate(c_in, c_out, V, L, TVL, kt, n_groups, isz, osz)
    if vmem_est > 12 * 1024 * 1024:
        # Raise the scoped VMEM limit only when needed; cap well below v7x's
        # 64 MiB physical VMEM to leave headroom for compiler scratch.
        compiler_kwargs["vmem_limit_bytes"] = int(
            min(2 * vmem_est, 48 * 1024 * 1024))

    kernel = _make_kernel(kt, L, TVL, n_vt, act)
    out_flat = pl.pallas_call(
        kernel,
        out_shape=jax.ShapeDtypeStruct((N, c_out, M_out), out_dtype),
        grid=grid,
        in_specs=in_specs,
        out_specs=out_specs,
        compiler_params=pltpu.CompilerParams(**compiler_kwargs),
        cost_estimate=cost,
    )(x_flat, w, b)

    # (N, C_out, V_out*L) -> (N, C_out, V_out, L): pure reshape, no transpose.
    return out_flat.reshape(N, c_out, V_out, L)


def init_params(key, kt, c_in, c_out, act):
    """Deterministic synthetic parameters (torch Conv2d weight (co,ci,kt,1)
    is stored here transposed as (kt, ci, co))."""
    ks = jax.random.split(key, 6)
    p = {
        "w_p": 0.1 * jax.random.normal(ks[0], (kt, c_in, c_out), jnp.float32),
        "b_p": 0.1 * jax.random.normal(ks[1], (1, c_out), jnp.float32),
    }
    if act == "GLU":
        p["w_g"] = 0.1 * jax.random.normal(ks[2], (kt, c_in, c_out), jnp.float32)
        p["b_g"] = 0.1 * jax.random.normal(ks[3], (1, c_out), jnp.float32)
    if c_in > c_out:
        p["w_align"] = 0.1 * jax.random.normal(ks[4], (c_in, c_out), jnp.float32)
        p["b_align"] = 0.1 * jax.random.normal(ks[5], (1, c_out), jnp.float32)
    return p


def reference(x, params, kt, c_in, c_out, act):
    """Pure-JAX replica of the PyTorch forward (for correctness check)."""
    xp = jnp.transpose(x, (0, 1, 3, 2))                # (N, C_in, V, L)
    N, _, V, L = xp.shape
    V_out = V - kt + 1

    if c_in > c_out:
        x_al = (jnp.einsum("ncvl,cd->ndvl", xp, params["w_align"])
                + params["b_align"].reshape(-1)[None, :, None, None])
    elif c_in < c_out:
        x_al = jnp.pad(xp, ((0, 0), (0, c_out - c_in), (0, 0), (0, 0)))
    else:
        x_al = xp
    x_in = x_al[:, :, kt - 1:, :]

    def conv(w, b):
        out = jnp.zeros((N, w.shape[-1], V_out, L), jnp.float32)
        out = out + b.reshape(-1)[None, :, None, None]
        for dk in range(kt):
            out = out + jnp.einsum("ncvl,cd->ndvl",
                                   xp[:, :, dk:dk + V_out, :], w[dk])
        return out

    cp = conv(params["w_p"], params["b_p"])
    if act == "GLU":
        cg = conv(params["w_g"], params["b_g"])
        return (cp + x_in) * jax.nn.sigmoid(cg)
    if act == "sigmoid":
        return jax.nn.sigmoid(cp + x_in)
    return jnp.maximum(cp + x_in, 0.0)


if __name__ == "__main__":
    key = jax.random.PRNGKey(0)
    k1, k2, k3, k4, k5, k6 = jax.random.split(key, 6)

    N, L, V, kt = 2, 8, 16, 3

    # Case 1: GLU, c_in == c_out (identity-Align fold), f32 compute — tight.
    c_in, c_out = 4, 4
    x = jax.random.normal(k1, (N, c_in, L, V), jnp.float32)
    params = init_params(k2, kt, c_in, c_out, "GLU")
    out = jax.block_until_ready(
        temporal_conv_layer(x, params, kt, c_in, c_out, "GLU",
                            compute_dtype=jnp.float32))
    ref = reference(x, params, kt, c_in, c_out, "GLU")
    assert out.shape == (N, c_out, V - kt + 1, L)
    assert jnp.allclose(out, ref, atol=1e-4, rtol=1e-4)

    # Case 2: relu, c_in > c_out (Align 1x1-conv fold), f32 compute — tight.
    c_in2, c_out2 = 6, 4
    x2 = jax.random.normal(k3, (N, c_in2, L, V), jnp.float32)
    params2 = init_params(k4, kt, c_in2, c_out2, "relu")
    out2 = jax.block_until_ready(
        temporal_conv_layer(x2, params2, kt, c_in2, c_out2, "relu",
                            compute_dtype=jnp.float32))
    ref2 = reference(x2, params2, kt, c_in2, c_out2, "relu")
    assert out2.shape == (N, c_out2, V - kt + 1, L)
    assert jnp.allclose(out2, ref2, atol=1e-4, rtol=1e-4)

    # Case 3: GLU, c_in < c_out (zero-pad Align fold), bf16 compute + bf16 out.
    c_in3, c_out3 = 4, 8
    x3 = jax.random.normal(k5, (N, c_in3, L, V), jnp.float32)
    params3 = init_params(k6, kt, c_in3, c_out3, "GLU")
    out3 = jax.block_until_ready(
        temporal_conv_layer(x3, params3, kt, c_in3, c_out3, "GLU",
                            compute_dtype=jnp.bfloat16,
                            out_dtype=jnp.bfloat16))
    assert out3.dtype == jnp.bfloat16
    # Compare against the reference evaluated on bf16-rounded inputs/weights
    # (so the residual difference is only accumulation order, the Align fold
    # rounding, and the bf16 output cast).
    x3_q = x3.astype(jnp.bfloat16).astype(jnp.float32)
    params3_q = {k: v.astype(jnp.bfloat16).astype(jnp.float32)
                 for k, v in params3.items()}
    ref3 = reference(x3_q, params3_q, kt, c_in3, c_out3, "GLU")
    assert out3.shape == (N, c_out3, V - kt + 1, L)
    assert float(jnp.max(jnp.abs(out3.astype(jnp.float32) - ref3))) < 5e-2

    print("KERNEL_OK")
</pallas_src>

<mosaic_0001>
module attributes {stable_mosaic.version = 11 : i64} {
  func.func @kernel(%arg0: i32, %arg1: i32, %arg2: memref<1x4x128xf32, #tpu.memory_space<vmem>>, %arg3: memref<2x4x12xf32, #tpu.memory_space<vmem>>, %arg4: memref<2x4x1xf32, #tpu.memory_space<vmem>>, %arg5: memref<1x4x112xf32, #tpu.memory_space<vmem>>) attributes {dimension_semantics = [#tpu.dimension_semantics<parallel>, #tpu.dimension_semantics<parallel>], iteration_bounds = array<i64: 2, 1>, scalar_prefetch = 0 : i64, scratch_operands = 0 : i64, tpu.core_type = #tpu.core_type<tc>, window_params = [{transform_indices = @transform_0, window_bounds = array<i64: 1, 4, 128>}, {pipeline_mode = #tpu.pipeline_mode<synchronous>, transform_indices = @transform_1, window_bounds = array<i64: 2, 4, 12>}, {pipeline_mode = #tpu.pipeline_mode<synchronous>, transform_indices = @transform_2, window_bounds = array<i64: 2, 4, 1>}, {transform_indices = @transform_3, window_bounds = array<i64: 1, 4, 112>}]} {
    %c0 = arith.constant 0 : index
    %c0_0 = arith.constant 0 : index
    %c0_1 = arith.constant 0 : index
    %0 = vector.load %arg2[%c0, %c0_0, %c0_1] : memref<1x4x128xf32, #tpu.memory_space<vmem>>, vector<1x4x112xf32>
    %1 = vector.shape_cast %0 : vector<1x4x112xf32> to vector<4x112xf32>
    %c0_2 = arith.constant 0 : index
    %c0_3 = arith.constant 0 : index
    %c8 = arith.constant 8 : index
    %2 = vector.load %arg2[%c0_2, %c0_3, %c8] : memref<1x4x128xf32, #tpu.memory_space<vmem>>, vector<1x4x112xf32>
    %3 = vector.shape_cast %2 : vector<1x4x112xf32> to vector<4x112xf32>
    %c0_4 = arith.constant 0 : index
    %c0_5 = arith.constant 0 : index
    %c16 = arith.constant 16 : index
    %4 = vector.load %arg2[%c0_4, %c0_5, %c16] : memref<1x4x128xf32, #tpu.memory_space<vmem>>, vector<1x4x112xf32>
    %5 = vector.shape_cast %4 : vector<1x4x112xf32> to vector<4x112xf32>
    %6 = tpu.concatenate %1, %3, %5 in 0 : vector<4x112xf32>, vector<4x112xf32>, vector<4x112xf32> -> vector<12x112xf32>
    %c0_6 = arith.constant 0 : index
    %c0_7 = arith.constant 0 : index
    %c0_8 = arith.constant 0 : index
    %7 = vector.load %arg3[%c0_6, %c0_7, %c0_8] : memref<2x4x12xf32, #tpu.memory_space<vmem>>, vector<1x4x12xf32>
    %8 = vector.shape_cast %7 : vector<1x4x12xf32> to vector<4x12xf32>
    %cst = arith.constant dense<0.000000e+00> : vector<4x112xf32>
    %9 = tpu.matmul %8, %6, %cst {dimension_numbers = #tpu.dot_dimension_numbers<[1], [0], [0], [1], [0, 0, 1, 1], [], []>} : vector<4x12xf32>, vector<12x112xf32>, vector<4x112xf32> -> vector<4x112xf32>
    %c0_9 = arith.constant 0 : index
    %c0_10 = arith.constant 0 : index
    %c0_11 = arith.constant 0 : index
    %10 = vector.load %arg4[%c0_9, %c0_10, %c0_11] : memref<2x4x1xf32, #tpu.memory_space<vmem>>, vector<1x4x1xf32>
    %11 = vector.shape_cast %10 : vector<1x4x1xf32> to vector<4x1xf32>
    %12 = vector.broadcast %11 : vector<4x1xf32> to vector<4x112xf32>
    %13 = arith.addf %9, %12 : vector<4x112xf32>
    %c1 = arith.constant 1 : index
    %c0_12 = arith.constant 0 : index
    %c0_13 = arith.constant 0 : index
    %14 = vector.load %arg3[%c1, %c0_12, %c0_13] : memref<2x4x12xf32, #tpu.memory_space<vmem>>, vector<1x4x12xf32>
    %15 = vector.shape_cast %14 : vector<1x4x12xf32> to vector<4x12xf32>
    %cst_14 = arith.constant dense<0.000000e+00> : vector<4x112xf32>
    %16 = tpu.matmul %15, %6, %cst_14 {dimension_numbers = #tpu.dot_dimension_numbers<[1], [0], [0], [1], [0, 0, 1, 1], [], []>} : vector<4x12xf32>, vector<12x112xf32>, vector<4x112xf32> -> vector<4x112xf32>
    %c1_15 = arith.constant 1 : index
    %c0_16 = arith.constant 0 : index
    %c0_17 = arith.constant 0 : index
    %17 = vector.load %arg4[%c1_15, %c0_16, %c0_17] : memref<2x4x1xf32, #tpu.memory_space<vmem>>, vector<1x4x1xf32>
    %18 = vector.shape_cast %17 : vector<1x4x1xf32> to vector<4x1xf32>
    %19 = vector.broadcast %18 : vector<4x1xf32> to vector<4x112xf32>
    %20 = arith.addf %16, %19 : vector<4x112xf32>
    %21 = arith.negf %20 : vector<4x112xf32>
    %22 = math.exp %21 : vector<4x112xf32>
    %cst_18 = arith.constant 1.000000e+00 : f32
    %23 = vector.broadcast %cst_18 : f32 to vector<4x112xf32>
    %24 = arith.addf %23, %22 : vector<4x112xf32>
    %25 = arith.divf %23, %24 : vector<4x112xf32>
    %26 = arith.mulf %13, %25 : vector<4x112xf32>
    %c0_19 = arith.constant 0 : index
    %c0_20 = arith.constant 0 : index
    %c0_21 = arith.constant 0 : index
    %27 = vector.load %arg5[%c0_19, %c0_20, %c0_21] : memref<1x4x112xf32, #tpu.memory_space<vmem>>, vector<1x4x112xf32>
    %28 = vector.shape_cast %27 : vector<1x4x112xf32> to vector<4x112xf32>
    %29 = vector.shape_cast %26 : vector<4x112xf32> to vector<1x4x112xf32>
    tpu.vector_store %arg5[%c0_19, %c0_20, %c0_21], %29 {strides = array<i32>} : memref<1x4x112xf32, #tpu.memory_space<vmem>>, vector<1x4x112xf32>,
    return
  }
  func.func @transform_0(%arg0: i32, %arg1: i32) -> (i32, i32, i32) {
    %c0_i32 = arith.constant 0 : i32
    %c0_i32_0 = arith.constant 0 : i32
    %c0_i32_1 = arith.constant 0 : i32
    return %arg0, %c0_i32, %c0_i32_0 : i32, i32, i32
  }
  func.func @transform_1(%arg0: i32, %arg1: i32) -> (i32, i32, i32) {
    %c0_i32 = arith.constant 0 : i32
    %c0_i32_0 = arith.constant 0 : i32
    %c0_i32_1 = arith.constant 0 : i32
    %c0_i32_2 = arith.constant 0 : i32
    return %c0_i32, %c0_i32_0, %c0_i32_1 : i32, i32, i32
  }
  func.func @transform_2(%arg0: i32, %arg1: i32) -> (i32, i32, i32) {
    %c0_i32 = arith.constant 0 : i32
    %c0_i32_0 = arith.constant 0 : i32
    %c0_i32_1 = arith.constant 0 : i32
    %c0_i32_2 = arith.constant 0 : i32
    return %c0_i32, %c0_i32_0, %c0_i32_1 : i32, i32, i32
  }
  func.func @transform_3(%arg0: i32, %arg1: i32) -> (i32, i32, i32) {
    %c0_i32 = arith.constant 0 : i32
    %c0_i32_0 = arith.constant 0 : i32
    return %arg0, %c0_i32, %arg1 : i32, i32, i32
  }
}

</mosaic_0001>

<bundles_post_ra>
// kernel: tpu_custom_call.1
= control target key start
LH: loop header
LB: loop body
LE: loop exit
PB: predicated region body
PF: predicated region fallthrough
CT: control target
= control target key end

     0   :  { %8 = vsyncpa [#allocation3], 0  ;;  %s901_s0 = inlined_call_operand.vmem [shape: f32[2,4,128], index: 0, kind: input, shape index: {}]   ;;  %s902_s1 = inlined_call_operand.hbm [shape: f32[2,4,12], index: 1, kind: input, shape index: {}]   ;;  %s903_s2 = inlined_call_operand.vmem [shape: f32[2,4,1], index: 2, kind: input, shape index: {}]   ;;  %s904_s3 = inlined_call_operand.hbm [shape: f32[2,4,112], index: 3, kind: output, shape index: {}]  }
   0x1   :  { %9 = vsyncpa [#allocation4], 0 }
   0x2   :  { %11 = vsyncpa [#allocation4 + $0x1], 0  ;;  %s745_s12 = smov 0   ;;  %s747_s13 = smov 0  }
   0x3   :  { %s749_s14 = smov 0   ;;  %s751_s15 = smov 0  }
   0x4   :  { %s753_s16 = smov 0   ;;  %s755_s17 = smov 0  }
   0x5 LB: > { %s474_s18 = sadd.s32 4294967295, %s712_s17   ;;  %s475_s19 = sadd.s32 4294967294, %s712_s17   ;;  %s712_s17 = sphi %s755_s17, %s17_s17   ;;  %s708_s16 = sphi %s753_s16, %s922_s16   ;;  %s704_s15 = sphi %s751_s15, %s921_s15   ;;  %s700_s14 = sphi %s749_s14, %s920_s14   ;;  %s696_s13 = sphi %s747_s13, %s919_s13   ;;  %s692_s12 = sphi %s745_s12, %s918_s12  }
   0x6   : > { %s29_s20 = sadd.s32 1, %s708_s16  ;;  %s106_s21 = sadd.s32 1, %s700_s14 }
   0x7   : > { %p31_p0 = scmp.ge.s32.totalorder %s29_s20, 2  ;;  %p116_p1 = scmp.ne.s32.totalorder %s700_s14, %s696_s13 }
   0x8   : > { %p117_p2 = scmp.eq.s32.totalorder %s474_s18, 1  ;;  %p122_p3 = scmp.ne.s32.totalorder %s696_s13, %s692_s12 }
   0x9   : > { %s924_s20 = smov (%p31_p0, %s29_s20), 0  ;;  %p123_p5 = scmp.eq.s32.totalorder %s475_s19, 1 }
   0xa   : > { %p785_p4 = por %p117_p2, %p116_p1  ;;  %s101_s23 = ssub.s32 %s708_s16, %s924_s20 }
   0xb   : > { %p476_p6 = scmp.ge.s32.totalorder %s712_s17, 1  ;;  %p104_p7 = scmp.eq.s32.totalorder %s101_s23, 0 }
   0xc   : > { %s909_s22 = scalar_select %p785_p4, 1, 0 }
   0xd   : > { %p792_p8 = por %p123_p5, %p122_p3  ;;  %p130_p9 = scmp.lt.s32.totalorder %s712_s17, 3 }
   0xe   : > { %s798_s25 = scalar_select %p104_p7, %s700_s14, %s106_s21  }
   0xf   : > { %s910_s24 = scalar_select %p792_p8, 1, 0 }
  0x10   : > { %p800_p10 = pnand %p476_p6, %p130_p9  ;;  %p804_p11 = scmp.eq.s32.totalorder %s474_s18, 0 }
  0x11   : > { %s714_s28 = smov [#allocation2]   ;;  %s602_s6 = scalar_lea.hbm %s902_s1, 128 }
  0x12   : > { %s911_s26 = scalar_select %p800_p10, 1, 0 }
  0x13   : > { %s912_s27 = scalar_select %p804_p11, 1, 0 }
  0x14   : > { %p527_p12 = pneg %p800_p10  ;;  %s142_s29 = sshll.u32 %s714_s28, 4  ;;  %s143_s29 = int_to_ptr.vmem [resolvable:$true] %s142_s29 }
  0x15   : > { %p603_p0 = scmp.ne.s32.totalorder %s902_s1, %s602_s6  ;;  %p609_p5 = scmp.lt.u32.totalorder %s602_s6, %s902_s1 }
  0x16   : > { %p812_p13 = pnand %p804_p11, %p527_p12 }
  0x18   : > { %p604_p1 = pneg %p812_p13 }
  0x1a   : > { %p605_p2 = pnand %p604_p1, %p603_p0 }
  0x1c   : > { %p606_p3 = pneg %p605_p2 }
  0x1e   : > { %p611_p6 = pnand %p609_p5, %p606_p3 }
  0x20   : > { %614 = shalt.err (!%p611_p6)
}
  0x21   : > { %s615_s11 = scalar_lea.vmem %s143_s29, 128  ;;  %p623_p8 = scmp.lt.s32.totalorder %s143_s29, %s143_s29 }
  0x22   : > { %p616_p7 = scmp.ne.s32.totalorder %s143_s29, %s615_s11  ;;  %p624_p4 = scmp.lt.s32.totalorder %s615_s11, %s615_s11 }
  0x24   : > { %p618_p9 = pnand %p616_p7, %p604_p1  ;;  %p625_p11 = por %p624_p4, %p623_p8 }
  0x26   : > { %p619_p12 = pneg %p618_p9 }
  0x28   : > { %p626_p10 = pnand %p625_p11, %p619_p12 }
  0x2a   : > { %629 = shalt.err (!%p626_p10)
}
  0x2b   : > { %s715_s18 = smov 64   ;;  %s716_s19 = smov 4  }
  0x2c   : > { %530 = dma.hbm_to_vmem [thread:$0]  (!%p812_p13), %s902_s1, 128, %s143_s29, [#allocation3], %s715_s18, %s715_s18, %s716_s19  }
  0x2d   : > { %p914_p0 = scmp.ne.s32.totalorder %s911_s26, 0 }
  0x2e   : > { %p915_p2 = scmp.ne.s32.totalorder (!%p914_p0), %s912_s27, 0 }
  0x2f   : > { %168 = sbr.rel (%p914_p0) target bundleno = 444 (0x1bc), region = 32 }
  0x36   : > { %683 = dma.done.wait (%p915_p2), [#allocation3], 128  }
  0x37   : > { %685 = vsyncadd (%p915_p2), [#allocation3], 4294967168  ;;  %p191_p4 = scmp.lt.s32.totalorder %s704_s15, 1  ;;  %v717_v0 = vmov 0.0|0.0   ;;  %vm718_vm0 = vmmov 0   ;;  %v719_v1 = vmov 0.0  }
  0x38   : > { %513 = vmatprep.subr.bf16.mxu0 %v717_v0  ;;  %517 = vmatprep.subr.bf16.mxu1 %v717_v0  ;;  %v720_v3 = vmov 0   ;;  %v485_v5 = vld [vmem:[%s903_s2 + $0x4] sm:$0xf]  ;;  %s721_s6 = smov 120   ;;  %v206_v6 = vld [vmem:[%s903_s2] sm:$0xf] }
  0x39   : > { %s192_s28 = scalar_select %p191_p4, %s704_s15, 1  ;;  %503 = vmatprep.mubr.msk.f32.mxu0 %vm718_vm0, %v719_v1  ;;  %510 = vmatprep.mubr.msk.f32.mxu1 %vm718_vm0, %v719_v1  ;;  %vm203_vm1 = vcmask 1043456   ;;  %vm723_vm2 = vmmov 1   ;;  %v205_v11 = vld [vmem:[#allocation2] sm:$0xf]  ;;  %vm212_vm4 = vcmask 97280  }
  0x3a   : > { %596 = vset.pattern.permute.xlu1 %v720_v3  ;;  %597 = vset.pattern.permute.xlu0 %v720_v3  ;;  %s722_s9 = smov 112   ;;  %vm515_vm3 = vmpackc.low %vm203_vm1, %vm723_vm2  ;;  %v289_v12 = vld [vmem:[#allocation2 + $0x4] sm:$0xf]  ;;  %s188_s10 = sand.u32 1, %s696_s13   ;;  %vm377_vm5 = vcmask 912384  }
  0x3b   : > { %s482_s30 = sshll.u32 %s192_s28, 2  ;;  %294 = vperm.xlu1 %596, %v485_v5   ;;  %s481_s11 = sshll.u32 %s188_s10, 2 }
  0x3c   : > { %s194_s4 = scalar_lea.vmem %s901_s0, %s482_s30  ;;  %s490_s18 = sshll.u32 %s704_s15, 6 }
  0x3d   : > { %v195_v2 = vld [vmem:[%s194_s4] sm:$0xf]  ;;  %s190_s19 = scalar_lea.vmem [#allocation5], %s481_s11  ;;  %s854_s30 = scalar_lea.hbm %s904_s3, %s490_s18 }
  0x3e   : > { %v197_v4 = vrot.slane %v195_v2, 4  ;;  %s394_s21 = sshll.u32 %s190_s19, 4  ;;  %s380_s26 = scalar_lea.sflag [#allocation4], %s188_s10  ;;  %s856_s21 = int_to_ptr.vmem [resolvable:$true] %s394_s21 }
  0x3f   : > { %209 = vperm.xlu1 %596, %v206_v6   ;;  %s630_s29 = scalar_lea.vmem %s856_s21, 64  ;;  %p916_p10 = scmp.ne.s32.totalorder %s909_s22, 0 }
  0x40   : > { %198 = vrot.lane.b32.xlu0 %v197_v4, %s721_s6  ;;  %p631_p8 = scmp.ne.s32.totalorder %s856_s21, %s630_s29  ;;  %s724_s15 = smov [#allocation5]  }
  0x41   : > { %s634_s4 = sshll.u32 %s724_s15, 4  ;;  %s635_s4 = int_to_ptr.vmem [resolvable:$false] %s634_s4 }
  0x42   : > { %p632_p11 = pnand %p631_p8, %p916_p10  ;;  %s636_s27 = scalar_lea.vmem %s635_s4, 128 }
  0x43   : > { %p637_p1 = scmp.lt.s32.totalorder %s856_s21, %s635_s4  ;;  %p638_p3 = scmp.lt.s32.totalorder %s636_s27, %s630_s29 }
  0x44   : > { %201 = vrot.lane.b32.xlu0 %v195_v2, %s722_s9  ;;  %p633_p13 = pneg %p632_p11 }
  0x45   : > { %p639_p5 = por %p638_p3, %p637_p1 }
  0x47   : > { %p640_p6 = pnand %p639_p5, %p633_p13 }
  0xb2   : > { %v199_v7 = vpop.permute.xlu0 %198 }
  0xb3   : > { %v204_v8 = vsel %vm203_vm1, %v195_v2, %v199_v7 }
  0xb6   : > { %v202_v9 = vpop.permute.xlu0 %201 }
  0xb7   : > { %v514_v10 = vpack.c.bf16 %v202_v9, %v204_v8 }
  0xb9   : > { %516 = vmatpush3.bf16.msk.msra.mxu0 %vm515_vm3, %v514_v10  ;;  %520 = vmatpush3.bf16.msk.msra.mxu1 %vm515_vm3, %v514_v10 }
  0xba   : > { %v295_v13 = vpop.permute.xlu1 %294 }
  0xbc   : > { %504 = vmatmul.mubr.msk.f32.vlgmr.msra.gmra.mrb[0].mxu0 %vm212_vm4, %v205_v11  ;;  %511 = vmatmul.mubr.msk.f32.vlgmr.msra.gmra.mrb[0].mxu1 %vm212_vm4, %v289_v12 }
  0xbe   : > { %v210_v22 = vpop.permute.xlu1 %209 }
 0x18f   : > { %v284_v14 = vpop.f32.mrb[0].mxu0  ;;  %v366_v15 = vpop.f32.mrb[0].mxu1 }
 0x190   : > { %v367_v16 = vadd.f32 %v366_v15, %v295_v13  ;;  %v512_v17 = vpop.f32.mrb[1].mxu1  ;;  %v505_v18 = vpop.f32.mrb[1].mxu0  ;;  %v285_v23 = vadd.f32 %v284_v14, %v210_v22 }
 0x192   : > { %v488_v19 = vmul.f32 -1.442695, %v367_v16 }
 0x194   : > { %598 = vpow2.f32 %v488_v19 }
 0x19e   : > { %v599_v20 = vpop.eup %598 }
 0x19f   : > { %v373_v21 = vadd.f32 1.0, %v599_v20 }
 0x1a1   : > { %600 = vrcp.f32 %v373_v21 }
 0x1ab   : > { %v601_v24 = vpop.eup %600 }
 0x1ac   : > { %v376_v25 = vmul.f32 %v601_v24, %v285_v23 }
 0x1ae   : > { %378 = vst.msk [vmem:[%s190_s19] sm:$0xf] %vm377_vm5, %v376_v25 }
 0x1af   : > { %643 = shalt.err (!%p640_p6)
}
 0x1b0   : > { %s644_s5 = scalar_lea.hbm %s854_s30, 64  ;;  %s648_s8 = scalar_lea.hbm %s904_s3, 128 }
 0x1b1   : > { %p645_p7 = scmp.ne.s32.totalorder %s854_s30, %s644_s5  ;;  %p649_p0 = scmp.lt.u32.totalorder %s854_s30, %s904_s3 }
 0x1b2   : > { %p650_p2 = scmp.lt.u32.totalorder %s648_s8, %s644_s5  ;;  %p652_p8 = scmp.lt.u32.totalorder %s644_s5, %s854_s30 }
 0x1b3   : > { %p646_p9 = pnand %p645_p7, %p916_p10 }
 0x1b4   : > { %p651_p4 = por %p650_p2, %p649_p0 }
 0x1b5   : > { %p647_p12 = pneg %p646_p9 }
 0x1b6   : > { %p653_p11 = por %p652_p8, %p651_p4 }
 0x1b8   : > { %p654_p13 = pnand %p653_p11, %p647_p12 }
 0x1ba   : > { %657 = shalt.err (!%p654_p13)
}
 0x1bb   : > { %525 = dma.vmem_to_hbm [thread:$0]  (%p916_p10), %s856_s21, 64, %s854_s30, %s380_s26  }
 0x1bc PF: > { %p537_p1 = scmp.ge.s32.totalorder %s712_s17, 2  ;;  %s406_s11 = sand.u32 1, %s692_s12  }
 0x1bd   : > { %p917_p3 = scmp.ne.s32.totalorder %s910_s24, 0  ;;  %s407_s18 = scalar_lea.sflag [#allocation4], %s406_s11 }
 0x1bf   : > { %p532_p5 = pnand %p537_p1, %p917_p3 }
 0x1c1   : > { %687 = dma.done.wait (!%p532_p5), %s407_s18, 64  }
 0x1c2   : > { %689 = vsyncadd (!%p532_p5), %s407_s18, 4294967232  ;;  %s17_s17 = sadd.s32 1, %s712_s17   ;;  %s918_s12 = smov %s696_s13 }
 0x1c3   : > { %p14_p6 = scmp.ge.s32.totalorder %s17_s17, 4   ;;  %s919_s13 = smov %s700_s14 }
 0x1c4   : > { %s920_s14 = smov %s798_s25  ;;  %s921_s15 = smov %s708_s16 }
 0x1c5   : > { %s922_s16 = smov %s924_s20  ;;  %16 = sbr.rel (!%p14_p6) target bundleno = 5 (0x5), region = 74 }
 0x1cc   :  { %412 = vsyncpa [#allocation3], 1 }
 0x1cd   :  { %414 = vsyncpa [#allocation3 + $0x1], 1 }
 0x1ce   :  { %415 = vsyncpa [#allocation4], 1 }
 0x1cf   :  { %417 = vsyncpa [#allocation4 + $0x1], 1 }

</bundles_post_ra>
